<compile_context>
chip_gen: v7x
topology: tpu7x:2x2x1
jax: 0.10.0
libtpu: 0.0.40
codegen_flags: <defaults>
</compile_context>

<pallas_src>
import jax
import jax.numpy as jnp
from jax.experimental import pallas as pl
from jax.experimental.pallas import tpu as pltpu

LANES = 128  # TPU lane width


def mlp_kernel(p_ref, x_ref, o_ref):
    """Fused 3-layer MLP on a lane-dense batch tile.

    p_ref: (35,) f32 in SMEM, flat parameters:
           w1[4,3]=p[0:12] (k*3+j), b1=p[12:15],
           w2[3,3]=p[15:24] (k*3+j), b2=p[24:27],
           w3[3,2]=p[27:33] (k*2+j), b3=p[33:35]
    x_ref: (4, SUB, 128) f32 VMEM  -- feature-major, batch on (sublane, lane)
    o_ref: (2, SUB, 128) f32 VMEM
    """
    # Load the 4 feature planes once; each is a fully dense (SUB, 128) slab.
    x = [x_ref[k] for k in range(4)]

    # Layer 1: Linear(4 -> 3) + ReLU  (12 FMAs, scalar-broadcast weights)
    h1 = []
    for j in range(3):
        acc = x[0] * p_ref[0 * 3 + j]
        for k in range(1, 4):
            acc = acc + x[k] * p_ref[k * 3 + j]
        h1.append(jnp.maximum(acc + p_ref[12 + j], 0.0))

    # Layer 2: Linear(3 -> 3) + ReLU  (9 FMAs)
    h2 = []
    for j in range(3):
        acc = h1[0] * p_ref[15 + 0 * 3 + j]
        for k in range(1, 3):
            acc = acc + h1[k] * p_ref[15 + k * 3 + j]
        h2.append(jnp.maximum(acc + p_ref[24 + j], 0.0))

    # Layer 3: Linear(3 -> 2) + Tanh  (6 FMAs, tanh on the EUP)
    for j in range(2):
        acc = h2[0] * p_ref[27 + 0 * 2 + j]
        for k in range(1, 3):
            acc = acc + h2[k] * p_ref[27 + k * 2 + j]
        o_ref[j] = jnp.tanh(acc + p_ref[33 + j])


def mlp_forward(x, params, *, max_sub_tile=512):
    """x: (B, 4) float32 -> (B, 2) float32."""
    w1, b1, w2, b2, w3, b3 = params
    B = x.shape[0]

    # Flatten all parameters into a single tiny SMEM-resident vector.
    p = jnp.concatenate([
        w1.reshape(-1), b1.reshape(-1),
        w2.reshape(-1), b2.reshape(-1),
        w3.reshape(-1), b3.reshape(-1),
    ]).astype(jnp.float32)

    # Pack batch onto (sublane, lane): (B, 4) -> (4, rows_pad, 128), zero-padded
    # to a whole number of tiles so no ragged tile is ever touched in-kernel.
    rows = -(-B // LANES)                                  # ceil(B / 128)
    sub_tile = min(max_sub_tile, ((rows + 7) // 8) * 8)    # multiple of 8 sublanes
    rows_pad = -(-rows // sub_tile) * sub_tile
    b_pad = rows_pad * LANES

    x_t = jnp.transpose(x.astype(jnp.float32))             # (4, B)
    x_t = jnp.pad(x_t, ((0, 0), (0, b_pad - B)))
    x_slab = x_t.reshape(4, rows_pad, LANES)

    # TODO(synk): on v6e/v7x a bf16 HBM transport (f32 accumulate in-kernel)
    # would halve HBM traffic; kept f32 end-to-end to match torch numerics.

    out_slab = pl.pallas_call(
        mlp_kernel,
        out_shape=jax.ShapeDtypeStruct((2, rows_pad, LANES), jnp.float32),
        grid=(rows_pad // sub_tile,),
        in_specs=[
            # All 35 parameters as scalars in SMEM (no per-step DMAs,
            # no padded (8,128) VMEM tiles per weight).
            pl.BlockSpec(memory_space=pltpu.MemorySpace.SMEM),
            pl.BlockSpec((4, sub_tile, LANES), lambda i: (0, i, 0)),
        ],
        out_specs=pl.BlockSpec((2, sub_tile, LANES), lambda i: (0, i, 0)),
        compiler_params=pltpu.CompilerParams(
            dimension_semantics=("parallel",),   # megacore on v7x; no-op v5e/v6e
        ),
    )(p, x_slab)

    out = out_slab.reshape(2, b_pad)[:, :B]                # drop padding
    return jnp.transpose(out)                              # (B, 2)


def init_params(key):
    """Deterministic init matching nn.Linear shapes (stored transposed: (in, out))."""
    k1, k2, k3, k4, k5, k6 = jax.random.split(key, 6)
    w1 = jax.random.uniform(k1, (4, 3), jnp.float32, -0.5, 0.5)
    b1 = jax.random.uniform(k2, (3,), jnp.float32, -0.5, 0.5)
    w2 = jax.random.uniform(k3, (3, 3), jnp.float32, -0.5, 0.5)
    b2 = jax.random.uniform(k4, (3,), jnp.float32, -0.5, 0.5)
    w3 = jax.random.uniform(k5, (3, 2), jnp.float32, -0.5, 0.5)
    b3 = jax.random.uniform(k6, (2,), jnp.float32, -0.5, 0.5)
    return (w1, b1, w2, b2, w3, b3)


def mlp_reference(x, params):
    """Pure-JAX reference for correctness check."""
    w1, b1, w2, b2, w3, b3 = params
    h = jnp.maximum(x @ w1 + b1, 0.0)
    h = jnp.maximum(h @ w2 + b2, 0.0)
    return jnp.tanh(h @ w3 + b3)


if __name__ == "__main__":
    key = jax.random.PRNGKey(0)
    kx, kx2, kp = jax.random.split(key, 3)
    params = init_params(kp)

    # Small case (single tile, exercises padding 8 -> 1024 batch slots).
    batch = 8
    x = jax.random.normal(kx, (batch, 4), dtype=jnp.float32)
    out = jax.block_until_ready(mlp_forward(x, params))
    ref = mlp_reference(x, params)
    assert out.shape == (batch, 2)
    assert jnp.allclose(out, ref, atol=1e-5, rtol=1e-5), "mismatch vs reference (small)"

    # Ragged, multi-tile case (forces grid > 1 with a tiny tile to test the
    # pipeline + tail-padding path cheaply).
    batch2 = 3000
    x2 = jax.random.normal(kx2, (batch2, 4), dtype=jnp.float32)
    out2 = jax.block_until_ready(mlp_forward(x2, params, max_sub_tile=8))
    ref2 = mlp_reference(x2, params)
    assert out2.shape == (batch2, 2)
    assert jnp.allclose(out2, ref2, atol=1e-5, rtol=1e-5), "mismatch vs reference (grid)"

    # TODO(synk): update_parameters (Adam step / MSE backward) is training logic,
    # not part of the forward pass — not implemented as a kernel.
    print("KERNEL_OK")
</pallas_src>

<mosaic_0001>
module attributes {stable_mosaic.version = 11 : i64} {
  func.func @mlp_kernel(%arg0: i32, %arg1: memref<35xf32, #tpu.memory_space<smem>>, %arg2: memref<4x8x128xf32, #tpu.memory_space<vmem>>, %arg3: memref<2x8x128xf32, #tpu.memory_space<vmem>>) attributes {dimension_semantics = [#tpu.dimension_semantics<parallel>], iteration_bounds = array<i64: 1>, scalar_prefetch = 0 : i64, scratch_operands = 0 : i64, tpu.core_type = #tpu.core_type<tc>, window_params = [{transform_indices = @transform_0, window_bounds = array<i64: 35>}, {transform_indices = @transform_1, window_bounds = array<i64: 4, 8, 128>}, {transform_indices = @transform_2, window_bounds = array<i64: 2, 8, 128>}]} {
    %c0 = arith.constant 0 : index
    %c0_0 = arith.constant 0 : index
    %c0_1 = arith.constant 0 : index
    %0 = vector.load %arg2[%c0, %c0_0, %c0_1] : memref<4x8x128xf32, #tpu.memory_space<vmem>>, vector<1x8x128xf32>
    %1 = vector.shape_cast %0 : vector<1x8x128xf32> to vector<8x128xf32>
    %c1 = arith.constant 1 : index
    %c0_2 = arith.constant 0 : index
    %c0_3 = arith.constant 0 : index
    %2 = vector.load %arg2[%c1, %c0_2, %c0_3] : memref<4x8x128xf32, #tpu.memory_space<vmem>>, vector<1x8x128xf32>
    %3 = vector.shape_cast %2 : vector<1x8x128xf32> to vector<8x128xf32>
    %c2 = arith.constant 2 : index
    %c0_4 = arith.constant 0 : index
    %c0_5 = arith.constant 0 : index
    %4 = vector.load %arg2[%c2, %c0_4, %c0_5] : memref<4x8x128xf32, #tpu.memory_space<vmem>>, vector<1x8x128xf32>
    %5 = vector.shape_cast %4 : vector<1x8x128xf32> to vector<8x128xf32>
    %c3 = arith.constant 3 : index
    %c0_6 = arith.constant 0 : index
    %c0_7 = arith.constant 0 : index
    %6 = vector.load %arg2[%c3, %c0_6, %c0_7] : memref<4x8x128xf32, #tpu.memory_space<vmem>>, vector<1x8x128xf32>
    %7 = vector.shape_cast %6 : vector<1x8x128xf32> to vector<8x128xf32>
    %c0_8 = arith.constant 0 : index
    %8 = memref.load %arg1[%c0_8] : memref<35xf32, #tpu.memory_space<smem>>
    %9 = vector.broadcast %8 : f32 to vector<8x128xf32>
    %10 = arith.mulf %1, %9 : vector<8x128xf32>
    %c3_9 = arith.constant 3 : index
    %11 = memref.load %arg1[%c3_9] : memref<35xf32, #tpu.memory_space<smem>>
    %12 = vector.broadcast %11 : f32 to vector<8x128xf32>
    %13 = arith.mulf %3, %12 : vector<8x128xf32>
    %14 = arith.addf %10, %13 : vector<8x128xf32>
    %c6 = arith.constant 6 : index
    %15 = memref.load %arg1[%c6] : memref<35xf32, #tpu.memory_space<smem>>
    %16 = vector.broadcast %15 : f32 to vector<8x128xf32>
    %17 = arith.mulf %5, %16 : vector<8x128xf32>
    %18 = arith.addf %14, %17 : vector<8x128xf32>
    %c9 = arith.constant 9 : index
    %19 = memref.load %arg1[%c9] : memref<35xf32, #tpu.memory_space<smem>>
    %20 = vector.broadcast %19 : f32 to vector<8x128xf32>
    %21 = arith.mulf %7, %20 : vector<8x128xf32>
    %22 = arith.addf %18, %21 : vector<8x128xf32>
    %c12 = arith.constant 12 : index
    %23 = memref.load %arg1[%c12] : memref<35xf32, #tpu.memory_space<smem>>
    %24 = vector.broadcast %23 : f32 to vector<8x128xf32>
    %25 = arith.addf %22, %24 : vector<8x128xf32>
    %cst = arith.constant 0.000000e+00 : f32
    %26 = vector.broadcast %cst : f32 to vector<8x128xf32>
    %27 = arith.maximumf %25, %26 : vector<8x128xf32>
    %c1_10 = arith.constant 1 : index
    %28 = memref.load %arg1[%c1_10] : memref<35xf32, #tpu.memory_space<smem>>
    %29 = vector.broadcast %28 : f32 to vector<8x128xf32>
    %30 = arith.mulf %1, %29 : vector<8x128xf32>
    %c4 = arith.constant 4 : index
    %31 = memref.load %arg1[%c4] : memref<35xf32, #tpu.memory_space<smem>>
    %32 = vector.broadcast %31 : f32 to vector<8x128xf32>
    %33 = arith.mulf %3, %32 : vector<8x128xf32>
    %34 = arith.addf %30, %33 : vector<8x128xf32>
    %c7 = arith.constant 7 : index
    %35 = memref.load %arg1[%c7] : memref<35xf32, #tpu.memory_space<smem>>
    %36 = vector.broadcast %35 : f32 to vector<8x128xf32>
    %37 = arith.mulf %5, %36 : vector<8x128xf32>
    %38 = arith.addf %34, %37 : vector<8x128xf32>
    %c10 = arith.constant 10 : index
    %39 = memref.load %arg1[%c10] : memref<35xf32, #tpu.memory_space<smem>>
    %40 = vector.broadcast %39 : f32 to vector<8x128xf32>
    %41 = arith.mulf %7, %40 : vector<8x128xf32>
    %42 = arith.addf %38, %41 : vector<8x128xf32>
    %c13 = arith.constant 13 : index
    %43 = memref.load %arg1[%c13] : memref<35xf32, #tpu.memory_space<smem>>
    %44 = vector.broadcast %43 : f32 to vector<8x128xf32>
    %45 = arith.addf %42, %44 : vector<8x128xf32>
    %cst_11 = arith.constant 0.000000e+00 : f32
    %46 = vector.broadcast %cst_11 : f32 to vector<8x128xf32>
    %47 = arith.maximumf %45, %46 : vector<8x128xf32>
    %c2_12 = arith.constant 2 : index
    %48 = memref.load %arg1[%c2_12] : memref<35xf32, #tpu.memory_space<smem>>
    %49 = vector.broadcast %48 : f32 to vector<8x128xf32>
    %50 = arith.mulf %1, %49 : vector<8x128xf32>
    %c5 = arith.constant 5 : index
    %51 = memref.load %arg1[%c5] : memref<35xf32, #tpu.memory_space<smem>>
    %52 = vector.broadcast %51 : f32 to vector<8x128xf32>
    %53 = arith.mulf %3, %52 : vector<8x128xf32>
    %54 = arith.addf %50, %53 : vector<8x128xf32>
    %c8 = arith.constant 8 : index
    %55 = memref.load %arg1[%c8] : memref<35xf32, #tpu.memory_space<smem>>
    %56 = vector.broadcast %55 : f32 to vector<8x128xf32>
    %57 = arith.mulf %5, %56 : vector<8x128xf32>
    %58 = arith.addf %54, %57 : vector<8x128xf32>
    %c11 = arith.constant 11 : index
    %59 = memref.load %arg1[%c11] : memref<35xf32, #tpu.memory_space<smem>>
    %60 = vector.broadcast %59 : f32 to vector<8x128xf32>
    %61 = arith.mulf %7, %60 : vector<8x128xf32>
    %62 = arith.addf %58, %61 : vector<8x128xf32>
    %c14 = arith.constant 14 : index
    %63 = memref.load %arg1[%c14] : memref<35xf32, #tpu.memory_space<smem>>
    %64 = vector.broadcast %63 : f32 to vector<8x128xf32>
    %65 = arith.addf %62, %64 : vector<8x128xf32>
    %cst_13 = arith.constant 0.000000e+00 : f32
    %66 = vector.broadcast %cst_13 : f32 to vector<8x128xf32>
    %67 = arith.maximumf %65, %66 : vector<8x128xf32>
    %c15 = arith.constant 15 : index
    %68 = memref.load %arg1[%c15] : memref<35xf32, #tpu.memory_space<smem>>
    %69 = vector.broadcast %68 : f32 to vector<8x128xf32>
    %70 = arith.mulf %27, %69 : vector<8x128xf32>
    %c18 = arith.constant 18 : index
    %71 = memref.load %arg1[%c18] : memref<35xf32, #tpu.memory_space<smem>>
    %72 = vector.broadcast %71 : f32 to vector<8x128xf32>
    %73 = arith.mulf %47, %72 : vector<8x128xf32>
    %74 = arith.addf %70, %73 : vector<8x128xf32>
    %c21 = arith.constant 21 : index
    %75 = memref.load %arg1[%c21] : memref<35xf32, #tpu.memory_space<smem>>
    %76 = vector.broadcast %75 : f32 to vector<8x128xf32>
    %77 = arith.mulf %67, %76 : vector<8x128xf32>
    %78 = arith.addf %74, %77 : vector<8x128xf32>
    %c24 = arith.constant 24 : index
    %79 = memref.load %arg1[%c24] : memref<35xf32, #tpu.memory_space<smem>>
    %80 = vector.broadcast %79 : f32 to vector<8x128xf32>
    %81 = arith.addf %78, %80 : vector<8x128xf32>
    %cst_14 = arith.constant 0.000000e+00 : f32
    %82 = vector.broadcast %cst_14 : f32 to vector<8x128xf32>
    %83 = arith.maximumf %81, %82 : vector<8x128xf32>
    %c16 = arith.constant 16 : index
    %84 = memref.load %arg1[%c16] : memref<35xf32, #tpu.memory_space<smem>>
    %85 = vector.broadcast %84 : f32 to vector<8x128xf32>
    %86 = arith.mulf %27, %85 : vector<8x128xf32>
    %c19 = arith.constant 19 : index
    %87 = memref.load %arg1[%c19] : memref<35xf32, #tpu.memory_space<smem>>
    %88 = vector.broadcast %87 : f32 to vector<8x128xf32>
    %89 = arith.mulf %47, %88 : vector<8x128xf32>
    %90 = arith.addf %86, %89 : vector<8x128xf32>
    %c22 = arith.constant 22 : index
    %91 = memref.load %arg1[%c22] : memref<35xf32, #tpu.memory_space<smem>>
    %92 = vector.broadcast %91 : f32 to vector<8x128xf32>
    %93 = arith.mulf %67, %92 : vector<8x128xf32>
    %94 = arith.addf %90, %93 : vector<8x128xf32>
    %c25 = arith.constant 25 : index
    %95 = memref.load %arg1[%c25] : memref<35xf32, #tpu.memory_space<smem>>
    %96 = vector.broadcast %95 : f32 to vector<8x128xf32>
    %97 = arith.addf %94, %96 : vector<8x128xf32>
    %cst_15 = arith.constant 0.000000e+00 : f32
    %98 = vector.broadcast %cst_15 : f32 to vector<8x128xf32>
    %99 = arith.maximumf %97, %98 : vector<8x128xf32>
    %c17 = arith.constant 17 : index
    %100 = memref.load %arg1[%c17] : memref<35xf32, #tpu.memory_space<smem>>
    %101 = vector.broadcast %100 : f32 to vector<8x128xf32>
    %102 = arith.mulf %27, %101 : vector<8x128xf32>
    %c20 = arith.constant 20 : index
    %103 = memref.load %arg1[%c20] : memref<35xf32, #tpu.memory_space<smem>>
    %104 = vector.broadcast %103 : f32 to vector<8x128xf32>
    %105 = arith.mulf %47, %104 : vector<8x128xf32>
    %106 = arith.addf %102, %105 : vector<8x128xf32>
    %c23 = arith.constant 23 : index
    %107 = memref.load %arg1[%c23] : memref<35xf32, #tpu.memory_space<smem>>
    %108 = vector.broadcast %107 : f32 to vector<8x128xf32>
    %109 = arith.mulf %67, %108 : vector<8x128xf32>
    %110 = arith.addf %106, %109 : vector<8x128xf32>
    %c26 = arith.constant 26 : index
    %111 = memref.load %arg1[%c26] : memref<35xf32, #tpu.memory_space<smem>>
    %112 = vector.broadcast %111 : f32 to vector<8x128xf32>
    %113 = arith.addf %110, %112 : vector<8x128xf32>
    %cst_16 = arith.constant 0.000000e+00 : f32
    %114 = vector.broadcast %cst_16 : f32 to vector<8x128xf32>
    %115 = arith.maximumf %113, %114 : vector<8x128xf32>
    %c27 = arith.constant 27 : index
    %116 = memref.load %arg1[%c27] : memref<35xf32, #tpu.memory_space<smem>>
    %117 = vector.broadcast %116 : f32 to vector<8x128xf32>
    %118 = arith.mulf %83, %117 : vector<8x128xf32>
    %c29 = arith.constant 29 : index
    %119 = memref.load %arg1[%c29] : memref<35xf32, #tpu.memory_space<smem>>
    %120 = vector.broadcast %119 : f32 to vector<8x128xf32>
    %121 = arith.mulf %99, %120 : vector<8x128xf32>
    %122 = arith.addf %118, %121 : vector<8x128xf32>
    %c31 = arith.constant 31 : index
    %123 = memref.load %arg1[%c31] : memref<35xf32, #tpu.memory_space<smem>>
    %124 = vector.broadcast %123 : f32 to vector<8x128xf32>
    %125 = arith.mulf %115, %124 : vector<8x128xf32>
    %126 = arith.addf %122, %125 : vector<8x128xf32>
    %c33 = arith.constant 33 : index
    %127 = memref.load %arg1[%c33] : memref<35xf32, #tpu.memory_space<smem>>
    %128 = vector.broadcast %127 : f32 to vector<8x128xf32>
    %129 = arith.addf %126, %128 : vector<8x128xf32>
    %130 = math.tanh %129 : vector<8x128xf32>
    %c0_17 = arith.constant 0 : index
    %c0_18 = arith.constant 0 : index
    %c0_19 = arith.constant 0 : index
    %131 = vector.load %arg3[%c0_17, %c0_18, %c0_19] : memref<2x8x128xf32, #tpu.memory_space<vmem>>, vector<1x8x128xf32>
    %132 = vector.shape_cast %131 : vector<1x8x128xf32> to vector<8x128xf32>
    %133 = vector.shape_cast %130 : vector<8x128xf32> to vector<1x8x128xf32>
    tpu.vector_store %arg3[%c0_17, %c0_18, %c0_19], %133 {strides = array<i32>} : memref<2x8x128xf32, #tpu.memory_space<vmem>>, vector<1x8x128xf32>,
    %c28 = arith.constant 28 : index
    %134 = memref.load %arg1[%c28] : memref<35xf32, #tpu.memory_space<smem>>
    %135 = vector.broadcast %134 : f32 to vector<8x128xf32>
    %136 = arith.mulf %83, %135 : vector<8x128xf32>
    %c30 = arith.constant 30 : index
    %137 = memref.load %arg1[%c30] : memref<35xf32, #tpu.memory_space<smem>>
    %138 = vector.broadcast %137 : f32 to vector<8x128xf32>
    %139 = arith.mulf %99, %138 : vector<8x128xf32>
    %140 = arith.addf %136, %139 : vector<8x128xf32>
    %c32 = arith.constant 32 : index
    %141 = memref.load %arg1[%c32] : memref<35xf32, #tpu.memory_space<smem>>
    %142 = vector.broadcast %141 : f32 to vector<8x128xf32>
    %143 = arith.mulf %115, %142 : vector<8x128xf32>
    %144 = arith.addf %140, %143 : vector<8x128xf32>
    %c34 = arith.constant 34 : index
    %145 = memref.load %arg1[%c34] : memref<35xf32, #tpu.memory_space<smem>>
    %146 = vector.broadcast %145 : f32 to vector<8x128xf32>
    %147 = arith.addf %144, %146 : vector<8x128xf32>
    %148 = math.tanh %147 : vector<8x128xf32>
    %c1_20 = arith.constant 1 : index
    %c0_21 = arith.constant 0 : index
    %c0_22 = arith.constant 0 : index
    %149 = vector.load %arg3[%c1_20, %c0_21, %c0_22] : memref<2x8x128xf32, #tpu.memory_space<vmem>>, vector<1x8x128xf32>
    %150 = vector.shape_cast %149 : vector<1x8x128xf32> to vector<8x128xf32>
    %151 = vector.shape_cast %148 : vector<8x128xf32> to vector<1x8x128xf32>
    tpu.vector_store %arg3[%c1_20, %c0_21, %c0_22], %151 {strides = array<i32>} : memref<2x8x128xf32, #tpu.memory_space<vmem>>, vector<1x8x128xf32>,
    return
  }
  func.func @transform_0(%arg0: i32) -> i32 {
    %c0_i32 = arith.constant 0 : i32
    %c0_i32_0 = arith.constant 0 : i32
    return %c0_i32 : i32
  }
  func.func @transform_1(%arg0: i32) -> (i32, i32, i32) {
    %c0_i32 = arith.constant 0 : i32
    %c0_i32_0 = arith.constant 0 : i32
    %c0_i32_1 = arith.constant 0 : i32
    return %c0_i32, %arg0, %c0_i32_0 : i32, i32, i32
  }
  func.func @transform_2(%arg0: i32) -> (i32, i32, i32) {
    %c0_i32 = arith.constant 0 : i32
    %c0_i32_0 = arith.constant 0 : i32
    %c0_i32_1 = arith.constant 0 : i32
    return %c0_i32, %arg0, %c0_i32_0 : i32, i32, i32
  }
}

</mosaic_0001>

<bundles_post_ra>
// kernel: tpu_custom_call.1
= control target key start
LH: loop header
LB: loop body
LE: loop exit
PB: predicated region body
PF: predicated region fallthrough
CT: control target
= control target key end

     0   :  { %7 = vsyncpa [#allocation5], 0  ;;  %s437_s0 = inlined_call_operand.hbm [shape: f32[35], index: 0, kind: input, shape index: {}]   ;;  %s438_s1 = inlined_call_operand.hbm [shape: f32[4,8,128], index: 1, kind: input, shape index: {}]   ;;  %s439_s2 = inlined_call_operand.hbm [shape: f32[2,8,128], index: 2, kind: output, shape index: {}]  }
   0x1   :  { %8 = vsyncpa [#allocation3], 0 }
   0x2   :  { %9 = vsyncpa [#allocation4], 0  ;;  %s240_s11 = scalar_lea.hbm %s437_s0, 16 }
   0x3   :  { %p241_p0 = scmp.ne.s32.totalorder %s437_s0, %s240_s11  ;;  %p244_p1 = scmp.lt.u32.totalorder %s240_s11, %s437_s0 }
   0x5   :  { %p246_p2 = pnand %p244_p1, %p241_p0 }
   0x7   :  { %249 = shalt.err (!%p246_p2)
}
   0x8   :  { %s300_s16 = smov [#allocation2]   ;;  %s301_s19 = smov [#allocation6]  }
   0x9   :  { %17 = dma.hbm_to_smem %s437_s0, 16, %s300_s16, [#allocation5]  }
   0xa   :  { %s23_s20 = sshll.u32 %s301_s19, 4  ;;  %s250_s23 = scalar_lea.hbm %s438_s1, 512  ;;  %s24_s20 = int_to_ptr.vmem [resolvable:$true] %s23_s20 }
   0xb   :  { %p251_p3 = scmp.ne.s32.totalorder %s438_s1, %s250_s23  ;;  %p254_p4 = scmp.lt.u32.totalorder %s250_s23, %s438_s1 }
   0xd   :  { %p256_p5 = pnand %p254_p4, %p251_p3 }
   0xf   :  { %259 = shalt.err (!%p256_p5)
}
  0x10   :  { %s260_s28 = scalar_lea.vmem %s24_s20, 512  ;;  %p265_p7 = scmp.lt.s32.totalorder %s24_s20, %s24_s20 }
  0x11   :  { %p261_p6 = scmp.ne.s32.totalorder %s24_s20, %s260_s28  ;;  %p266_p8 = scmp.lt.s32.totalorder %s260_s28, %s260_s28 }
  0x13   :  { %p267_p9 = por %p266_p8, %p265_p7 }
  0x15   :  { %p268_p10 = pnand %p267_p9, %p261_p6 }
  0x17   :  { %271 = shalt.err (!%p268_p10)
}
  0x18   :  { %s302_s0 = smov 128   ;;  %s303_s29 = smov 8  }
  0x19   :  { %29 = dma.hbm_to_vmem [thread:$0]  %s438_s1, 512, %s24_s20, [#allocation3], %s302_s0, %s302_s0, %s303_s29  }
  0x1a   :  { %294 = dma.done.wait [#allocation5], 16  }
  0x1b   :  { %295 = vsyncadd [#allocation5], 4294967280 }
  0x1c   :  { %296 = dma.done.wait [#allocation3], 512  }
  0x1d   :  { %297 = vsyncadd [#allocation3], 4294966784 }
  0x1e   :  { %36 = sfence }
  0x1f   :  { %s44_s4 = sld [smem:[#allocation2]]  ;;  %s197_s5 = sld [smem:[#allocation2 + $0x3]]  ;;  %v37_v0 = vld [vmem:[#allocation6] sm:$0xff]  ;;  %v39_v1 = vld [vmem:[#allocation6 + $0x8] sm:$0xff]  ;;  %v41_v2 = vld [vmem:[#allocation6 + $0x10] sm:$0xff] }
  0x20   :  { %s198_s6 = sld [smem:[#allocation2 + $0x6]]  ;;  %s199_s7 = sld [smem:[#allocation2 + $0x9]]  ;;  %v43_v3 = vld [vmem:[#allocation6 + $0x18] sm:$0xff] }
  0x21   :  { %s201_s8 = sld [smem:[#allocation2 + $0x1]]  ;;  %s202_s9 = sld [smem:[#allocation2 + $0x4]] }
  0x22   :  { %s203_s10 = sld [smem:[#allocation2 + $0x7]]  ;;  %s347_s11 = sld [smem:[#allocation2 + $0xa]] }
  0x23   :  { %s349_s12 = sld [smem:[#allocation2 + $0xc]]  ;;  %s351_s1 = sld [smem:[#allocation2 + $0x2]] }
  0x24   :  { %s353_s13 = sld [smem:[#allocation2 + $0x5]]  ;;  %s355_s14 = sld [smem:[#allocation2 + $0x8]] }
  0x25   :  { %v45_v4 = vstv %s44_s4  ;;  %v48_v6 = vstv %s197_s5  ;;  %s357_s15 = sld [smem:[#allocation2 + $0xd]]  ;;  %s359_s16 = sld [smem:[#allocation2 + $0xb]] }
  0x26   :  { %v46_v5 = vmul.f32 %v45_v4, %v37_v0  ;;  %v52_v7 = vstv %s198_s6  ;;  %v49_v8 = vmul.f32 %v48_v6, %v39_v1  ;;  %v56_v10 = vstv %s199_s7  ;;  %s361_s17 = sld [smem:[#allocation2 + $0xf]]  ;;  %s363_s18 = sld [smem:[#allocation2 + $0xe]] }
  0x27   :  { %v53_v9 = vmul.f32 %v52_v7, %v41_v2  ;;  %v57_v11 = vmul.f32 %v56_v10, %v43_v3  ;;  %v64_v12 = vstv %s201_s8  ;;  %v67_v13 = vstv %s202_s9  ;;  %s365_s19 = sld [smem:[#allocation2 + $0x10]]  ;;  %s369_s20 = sld [smem:[#allocation2 + $0x12]] }
  0x28   :  { %v50_v14 = vadd.f32 %v49_v8, %v46_v5  ;;  %v65_v15 = vmul.f32 %v64_v12, %v37_v0  ;;  %v68_v16 = vmul.f32 %v67_v13, %v39_v1  ;;  %v71_v17 = vstv %s203_s10  ;;  %s371_s21 = sld [smem:[#allocation2 + $0x13]]  ;;  %s373_s22 = sld [smem:[#allocation2 + $0x11]] }
  0x29   :  { %v72_v18 = vmul.f32 %v71_v17, %v41_v2  ;;  %v75_v19 = vstv %s347_s11  ;;  %v83_v20 = vstv %s351_s1  ;;  %s375_s23 = sld [smem:[#allocation2 + $0x14]]  ;;  %v60_v25 = vstv %s349_s12  ;;  %s381_s24 = sld [smem:[#allocation2 + $0x15]] }
  0x2a   :  { %v54_v21 = vadd.f32 %v53_v9, %v50_v14  ;;  %v69_v22 = vadd.f32 %v68_v16, %v65_v15  ;;  %v76_v23 = vmul.f32 %v75_v19, %v43_v3  ;;  %v84_v24 = vmul.f32 %v83_v20, %v37_v0  ;;  %s384_s25 = sld [smem:[#allocation2 + $0x16]]  ;;  %s386_s26 = sld [smem:[#allocation2 + $0x17]] }
  0x2b   :  { %v86_v26 = vstv %s353_s13  ;;  %v90_v27 = vstv %s355_s14  ;;  %v94_v28 = vstv %s359_s16  ;;  %v79_v33 = vstv %s357_s15  ;;  %s390_s27 = sld [smem:[#allocation2 + $0x18]]  ;;  %s396_s28 = sld [smem:[#allocation2 + $0x19]] }
  0x2c   :  { %v58_v29 = vadd.f32 %v57_v11, %v54_v21  ;;  %v73_v30 = vadd.f32 %v72_v18, %v69_v22  ;;  %v87_v31 = vmul.f32 %v86_v26, %v39_v1  ;;  %v91_v32 = vmul.f32 %v90_v27, %v41_v2  ;;  %s399_s30 = sld [smem:[#allocation2 + $0x1a]]  ;;  %s401_s3 = sld [smem:[#allocation2 + $0x1b]] }
  0x2d   :  { %v95_v37 = vmul.f32 %v94_v28, %v43_v3  ;;  %v102_v38 = vstv %s361_s17  ;;  %v117_v39 = vstv %s365_s19  ;;  %v98_v44 = vstv %s363_s18  ;;  %s403_s4 = sld [smem:[#allocation2 + $0x1d]]  ;;  %s405_s5 = sld [smem:[#allocation2 + $0x1f]] }
  0x2e   :  { %v61_v34 = vadd.f32 %v60_v25, %v58_v29  ;;  %v77_v35 = vadd.f32 %v76_v23, %v73_v30  ;;  %v88_v36 = vadd.f32 %v87_v31, %v84_v24  ;;  %v132_v43 = vstv %s373_s22  ;;  %s410_s6 = sld [smem:[#allocation2 + $0x1c]]  ;;  %s412_s7 = sld [smem:[#allocation2 + $0x1e]] }
  0x2f   :  { %v105_v45 = vstv %s369_s20  ;;  %v120_v46 = vstv %s371_s21  ;;  %v135_v47 = vstv %s375_s23  ;;  %v109_v57 = vstv %s381_s24  ;;  %s229_s8 = sld [smem:[#allocation2 + $0x20]]  ;;  %s226_s9 = sld [smem:[#allocation2 + $0x21]] }
  0x30   :  { %v62_v40 = vmax.f32 %v61_v34, 0.0  ;;  %v80_v41 = vadd.f32 %v79_v33, %v77_v35  ;;  %v92_v42 = vadd.f32 %v91_v32, %v88_v36  ;;  %v124_v58 = vstv %s384_s25  ;;  %s230_s10 = sld [smem:[#allocation2 + $0x22]]  ;;  %s304_s11 = smov [#allocation7]  }
  0x31   :  { %v139_v59 = vstv %s386_s26  ;;  %v113_v3 = vstv %s390_s27  ;;  %v128_v4 = vstv %s396_s28  ;;  %s184_s12 = sshll.u32 %s304_s11, 4  ;;  %s185_s12 = int_to_ptr.vmem [resolvable:$true] %s184_s12 }
  0x32   :  { %v81_v48 = vmax.f32 %v80_v41, 0.0  ;;  %v96_v49 = vadd.f32 %v95_v37, %v92_v42  ;;  %v103_v50 = vmul.f32 %v102_v38, %v62_v40  ;;  %v118_v51 = vmul.f32 %v117_v39, %v62_v40  ;;  %s272_s1 = scalar_lea.vmem %s185_s12, 256  ;;  %p277_p12 = scmp.lt.s32.totalorder %s185_s12, %s185_s12 }
  0x33   :  { %v133_v52 = vmul.f32 %v132_v43, %v62_v40  ;;  %v143_v5 = vstv %s399_s30  ;;  %v147_v12 = vstv %s401_s3  ;;  %v150_v13 = vstv %s403_s4  ;;  %p273_p11 = scmp.ne.s32.totalorder %s185_s12, %s272_s1  ;;  %p278_p13 = scmp.lt.s32.totalorder %s272_s1, %s272_s1 }
  0x34   :  { %v99_v53 = vadd.f32 %v98_v44, %v96_v49  ;;  %v106_v54 = vmul.f32 %v105_v45, %v81_v48  ;;  %v121_v55 = vmul.f32 %v120_v46, %v81_v48  ;;  %v136_v56 = vmul.f32 %v135_v47, %v81_v48 }
  0x35   :  { %v154_v14 = vstv %s405_s5  ;;  %v163_v15 = vstv %s410_s6  ;;  %v166_v16 = vstv %s412_s7  ;;  %v170_v20 = vstv %s229_s8  ;;  %p279_p0 = por %p278_p13, %p277_p12 }
  0x36   :  { %v100_v60 = vmax.f32 %v99_v53, 0.0  ;;  %v107_v61 = vadd.f32 %v106_v54, %v103_v50  ;;  %v122_v62 = vadd.f32 %v121_v55, %v118_v51  ;;  %v137_v63 = vadd.f32 %v136_v56, %v133_v52 }
  0x37   :  { %v158_v28 = vstv %s226_s9  ;;  %v174_v31 = vstv %s230_s10  ;;  %p280_p1 = pnand %p279_p0, %p273_p11 }
  0x38   :  { %v110_v0 = vmul.f32 %v109_v57, %v100_v60  ;;  %v125_v1 = vmul.f32 %v124_v58, %v100_v60  ;;  %v140_v2 = vmul.f32 %v139_v59, %v100_v60 }
  0x3a   :  { %v111_v6 = vadd.f32 %v110_v0, %v107_v61  ;;  %v126_v7 = vadd.f32 %v125_v1, %v122_v62  ;;  %v141_v8 = vadd.f32 %v140_v2, %v137_v63 }
  0x3c   :  { %v114_v9 = vadd.f32 %v113_v3, %v111_v6  ;;  %v129_v10 = vadd.f32 %v128_v4, %v126_v7  ;;  %v144_v11 = vadd.f32 %v143_v5, %v141_v8 }
  0x3e   :  { %v115_v17 = vmax.f32 %v114_v9, 0.0  ;;  %v130_v18 = vmax.f32 %v129_v10, 0.0  ;;  %v145_v19 = vmax.f32 %v144_v11, 0.0 }
  0x40   :  { %v148_v21 = vmul.f32 %v147_v12, %v115_v17  ;;  %v151_v22 = vmul.f32 %v150_v13, %v130_v18  ;;  %v155_v23 = vmul.f32 %v154_v14, %v145_v19  ;;  %v164_v24 = vmul.f32 %v163_v15, %v115_v17 }
  0x41   :  { %v167_v25 = vmul.f32 %v166_v16, %v130_v18  ;;  %v171_v26 = vmul.f32 %v170_v20, %v145_v19 }
  0x42   :  { %v152_v27 = vadd.f32 %v151_v22, %v148_v21 }
  0x43   :  { %v168_v29 = vadd.f32 %v167_v25, %v164_v24 }
  0x44   :  { %v156_v30 = vadd.f32 %v155_v23, %v152_v27 }
  0x45   :  { %v172_v32 = vadd.f32 %v171_v26, %v168_v29 }
  0x46   :  { %v159_v33 = vadd.f32 %v158_v28, %v156_v30 }
  0x47   :  { %v175_v34 = vadd.f32 %v174_v31, %v172_v32 }
  0x48   :  { %236 = vtanh.f32 %v159_v33 }
  0x49   :  { %238 = vtanh.f32 %v175_v34 }
  0x52   :  { %v237_v35 = vpop.eup %236 }
  0x53   :  { %v239_v36 = vpop.eup %238  ;;  %161 = vst [vmem:[#allocation7] sm:$0xff] %v237_v35 }
  0x54   :  { %178 = vst [vmem:[#allocation7 + $0x8] sm:$0xff] %v239_v36 }
  0x55   :  { %283 = shalt.err (!%p280_p1)
}
  0x56   :  { %s284_s15 = scalar_lea.hbm %s439_s2, 256 }
  0x57   :  { %p285_p2 = scmp.ne.s32.totalorder %s439_s2, %s284_s15  ;;  %p288_p3 = scmp.lt.u32.totalorder %s284_s15, %s439_s2 }
  0x59   :  { %p290_p4 = pnand %p288_p3, %p285_p2 }
  0x5b   :  { %293 = shalt.err (!%p290_p4)
}
  0x5c   :  { %190 = dma.vmem_to_hbm [thread:$0]  %s185_s12, 256, %s439_s2, [#allocation4], %s302_s0, %s302_s0, %s303_s29  }
  0x5d   :  { %298 = dma.done.wait [#allocation4], 256  }
  0x5e   :  { %299 = vsyncadd [#allocation4], 4294967040 }
  0x5f   :  { %194 = vsyncpa [#allocation3], 1 }
  0x60   :  { %195 = vsyncpa [#allocation4], 1 }
  0x61   :  { %196 = vsyncpa [#allocation5], 1 }

</bundles_post_ra>
